<compile_context>
chip_gen: v6e
topology: v6e:2x2x1
jax: 0.10.0
libtpu: 0.0.40
codegen_flags: <defaults>
</compile_context>

<pallas_src>
import functools

import jax
import jax.numpy as jnp
from jax.experimental import pallas as pl
from jax.experimental.pallas import tpu as pltpu

_LANES = 128
_SUBLANES = 8
_MAX_BLOCK_ROWS = 1024  # (1024, 128) f32 = 512 KiB per block


# ---------------------------------------------------------------------------
# Kernel 1: global reduction -> sum and sum-of-squares.
# Block-shaped VMEM accumulators (element-wise adds only); single cross-lane
# reduce + (1,1) output write in the final grid step.
# ---------------------------------------------------------------------------
def _stats_kernel(x_ref, sum_ref, sq_ref, acc_sum, acc_sq, *, rows, block_rows):
    i = pl.program_id(0)

    @pl.when(i == 0)
    def _():
        acc_sum[...] = jnp.zeros_like(acc_sum)
        acc_sq[...] = jnp.zeros_like(acc_sq)

    x = x_ref[...].astype(jnp.float32)

    # Only a ragged last block (undefined VMEM overhang) needs masking; the
    # element-level padding added by the wrapper is zeros and contributes 0.
    # Static Python guard: aligned inputs emit no mask code at all.
    if rows % block_rows != 0:
        row_ids = jax.lax.broadcasted_iota(jnp.int32, x.shape, 0)
        global_row = i * block_rows + row_ids
        x = jnp.where(global_row < rows, x, 0.0)

    acc_sum[...] += x
    acc_sq[...] += x * x

    @pl.when(i == pl.num_programs(0) - 1)
    def _():
        sum_ref[...] = jnp.sum(acc_sum[...]).reshape(1, 1)
        sq_ref[...] = jnp.sum(acc_sq[...]).reshape(1, 1)


# ---------------------------------------------------------------------------
# Kernel 2: elementwise (x - mean) * inv_std; scalars come from SMEM.
# ---------------------------------------------------------------------------
def _normalize_kernel(params_ref, x_ref, o_ref):
    mean = params_ref[0]
    inv_std = params_ref[1]
    x = x_ref[...].astype(jnp.float32)
    o_ref[...] = ((x - mean) * inv_std).astype(o_ref.dtype)


def _global_stats_pallas(x2d, n_valid, block_rows):
    rows = x2d.shape[0]
    grid = (pl.cdiv(rows, block_rows),)
    kernel = functools.partial(_stats_kernel, rows=rows, block_rows=block_rows)
    s, sq = pl.pallas_call(
        kernel,
        out_shape=(
            jax.ShapeDtypeStruct((1, 1), jnp.float32),
            jax.ShapeDtypeStruct((1, 1), jnp.float32),
        ),
        grid=grid,
        in_specs=[pl.BlockSpec((block_rows, _LANES), lambda i: (i, 0))],
        out_specs=(
            pl.BlockSpec((1, 1), lambda i: (0, 0)),
            pl.BlockSpec((1, 1), lambda i: (0, 0)),
        ),
        scratch_shapes=[
            pltpu.VMEM((block_rows, _LANES), jnp.float32),
            pltpu.VMEM((block_rows, _LANES), jnp.float32),
        ],
        compiler_params=pltpu.CompilerParams(dimension_semantics=("arbitrary",)),
    )(x2d)
    n = jnp.float32(n_valid)
    mean = s[0, 0] / n
    # torch.std() is unbiased (correction=1); padded zeros contribute nothing.
    var = (sq[0, 0] - n * mean * mean) / (n - 1.0)
    var = jnp.maximum(var, 0.0)  # guard tiny negative from rounding
    std = jnp.sqrt(var)
    return mean, std


def _normalize_pallas(x2d, mean_f32, inv_std_f32, out_dtype, block_rows):
    rows = x2d.shape[0]
    grid = (pl.cdiv(rows, block_rows),)
    params = jnp.stack(
        [jnp.asarray(mean_f32, jnp.float32), jnp.asarray(inv_std_f32, jnp.float32)]
    )
    return pl.pallas_call(
        _normalize_kernel,
        out_shape=jax.ShapeDtypeStruct(x2d.shape, out_dtype),
        grid=grid,
        in_specs=[
            pl.BlockSpec(memory_space=pltpu.MemorySpace.SMEM),
            pl.BlockSpec((block_rows, _LANES), lambda i: (i, 0)),
        ],
        out_specs=pl.BlockSpec((block_rows, _LANES), lambda i: (i, 0)),
        compiler_params=pltpu.CompilerParams(dimension_semantics=("parallel",)),
    )(params, x2d)


class ZScoreStandardize:
    """Pallas port of the torch ZScoreStandardize module (dim=None default)."""

    def __init__(self, dim=None):
        self.dim = dim

    def __call__(self, img, cache=None):
        img = jnp.asarray(img)
        n = img.size
        flat = img.reshape(-1)

        # Pad only when the element count is not already a multiple of 8*128
        # (common NCHW image sizes are aligned, so this usually costs nothing).
        pad = (-n) % (_SUBLANES * _LANES)
        if pad:
            flat = jnp.concatenate([flat, jnp.zeros((pad,), flat.dtype)])
        x2d = flat.reshape(-1, _LANES)
        rows = x2d.shape[0]
        block_rows = min(_MAX_BLOCK_ROWS, rows)  # rows is a multiple of 8

        if cache is not None and getattr(cache, "size", 0):
            mean, std = cache[0], cache[1]
        elif self.dim is not None:
            # TODO(synk): per-dim (keepdim) reduction path not implemented in
            # Pallas; the module's default constructor uses dim=None.
            raise NotImplementedError("dim != None path not implemented")
        else:
            mean, std = _global_stats_pallas(x2d, n, block_rows)

        mean_f = jnp.asarray(mean, jnp.float32)
        std_f = jnp.asarray(std, jnp.float32)
        inv_std = 1.0 / std_f

        out2d = _normalize_pallas(x2d, mean_f, inv_std, img.dtype, block_rows)
        if pad:
            out = out2d.reshape(-1)[:n].reshape(img.shape)
        else:
            out = out2d.reshape(img.shape)

        new_cache = jnp.stack(
            [jnp.asarray(mean, img.dtype), jnp.asarray(std, img.dtype)], axis=0
        )
        return out, new_cache


if __name__ == "__main__":
    key = jax.random.PRNGKey(0)
    x = jax.random.normal(key, (2, 4, 16, 16), dtype=jnp.float32)  # NCHW

    mod = ZScoreStandardize()  # dim=None, no cache: global mean/std
    out, cache = mod(x)
    out = jax.block_until_ready(out)
    cache = jax.block_until_ready(cache)

    # Reference (matches torch: global mean, unbiased std).
    mean_ref = x.mean()
    std_ref = x.std(ddof=1)
    ref = (x - mean_ref) / std_ref

    assert out.shape == x.shape and out.dtype == x.dtype
    assert cache.shape == (2,)
    assert jnp.allclose(out, ref, rtol=1e-4, atol=1e-5)
    assert jnp.allclose(cache, jnp.stack([mean_ref, std_ref]), rtol=1e-4, atol=1e-6)

    # Second call re-using the cache (the other forward branch).
    out2, _ = mod(x, cache=cache)
    out2 = jax.block_until_ready(out2)
    assert jnp.allclose(out2, ref, rtol=1e-4, atol=1e-5)

    # Non-aligned element count exercises the pad + ragged-block mask path.
    y = jax.random.normal(jax.random.PRNGKey(1), (3, 5, 7, 11), dtype=jnp.float32)
    out3, _ = ZScoreStandardize()(y)
    out3 = jax.block_until_ready(out3)
    ref3 = (y - y.mean()) / y.std(ddof=1)
    assert jnp.allclose(out3, ref3, rtol=1e-4, atol=1e-5)

    print("KERNEL_OK")
</pallas_src>

<mosaic_0001>
module attributes {stable_mosaic.version = 11 : i64} {
  func.func @_stats_kernel(%arg0: i32, %arg1: memref<16x128xf32, #tpu.memory_space<vmem>>, %arg2: memref<1x1xf32, #tpu.memory_space<vmem>>, %arg3: memref<1x1xf32, #tpu.memory_space<vmem>>, %arg4: memref<16x128xf32, #tpu.memory_space<vmem>>, %arg5: memref<16x128xf32, #tpu.memory_space<vmem>>) attributes {dimension_semantics = [#tpu.dimension_semantics<arbitrary>], iteration_bounds = array<i64: 1>, scalar_prefetch = 0 : i64, scratch_operands = 2 : i64, tpu.core_type = #tpu.core_type<tc>, window_params = [{transform_indices = @transform_0, window_bounds = array<i64: 16, 128>}, {pipeline_mode = #tpu.pipeline_mode<synchronous>, transform_indices = @transform_1, window_bounds = array<i64: 1, 1>}, {pipeline_mode = #tpu.pipeline_mode<synchronous>, transform_indices = @transform_2, window_bounds = array<i64: 1, 1>}]} {
    %c0_i32 = arith.constant 0 : i32
    %0 = arith.cmpi eq, %arg0, %c0_i32 : i32
    %1 = arith.extui %0 : i1 to i32
    %c0_i32_0 = arith.constant 0 : i32
    %2 = arith.cmpi ne, %1, %c0_i32_0 : i32
    scf.if %2 {
      %cst = arith.constant 0.000000e+00 : f32
      %14 = vector.broadcast %cst : f32 to vector<16x128xf32>
      %c0_12 = arith.constant 0 : index
      %c0_13 = arith.constant 0 : index
      %15 = vector.load %arg4[%c0_12, %c0_13] : memref<16x128xf32, #tpu.memory_space<vmem>>, vector<16x128xf32>
      tpu.vector_store %arg4[%c0_12, %c0_13], %14 {strides = array<i32>} : memref<16x128xf32, #tpu.memory_space<vmem>>, vector<16x128xf32>,
      %cst_14 = arith.constant 0.000000e+00 : f32
      %16 = vector.broadcast %cst_14 : f32 to vector<16x128xf32>
      %c0_15 = arith.constant 0 : index
      %c0_16 = arith.constant 0 : index
      %17 = vector.load %arg5[%c0_15, %c0_16] : memref<16x128xf32, #tpu.memory_space<vmem>>, vector<16x128xf32>
      tpu.vector_store %arg5[%c0_15, %c0_16], %16 {strides = array<i32>} : memref<16x128xf32, #tpu.memory_space<vmem>>, vector<16x128xf32>,
    } else {
    }
    %c0 = arith.constant 0 : index
    %c0_1 = arith.constant 0 : index
    %3 = vector.load %arg1[%c0, %c0_1] : memref<16x128xf32, #tpu.memory_space<vmem>>, vector<16x128xf32>
    %c0_2 = arith.constant 0 : index
    %c0_3 = arith.constant 0 : index
    %4 = vector.load %arg4[%c0_2, %c0_3] : memref<16x128xf32, #tpu.memory_space<vmem>>, vector<16x128xf32>
    %5 = arith.addf %4, %3 : vector<16x128xf32>
    %c0_4 = arith.constant 0 : index
    %c0_5 = arith.constant 0 : index
    %6 = vector.load %arg4[%c0_4, %c0_5] : memref<16x128xf32, #tpu.memory_space<vmem>>, vector<16x128xf32>
    tpu.vector_store %arg4[%c0_4, %c0_5], %5 {strides = array<i32>} : memref<16x128xf32, #tpu.memory_space<vmem>>, vector<16x128xf32>,
    %c0_6 = arith.constant 0 : index
    %c0_7 = arith.constant 0 : index
    %7 = vector.load %arg5[%c0_6, %c0_7] : memref<16x128xf32, #tpu.memory_space<vmem>>, vector<16x128xf32>
    %8 = arith.mulf %3, %3 : vector<16x128xf32>
    %9 = arith.addf %7, %8 : vector<16x128xf32>
    %c0_8 = arith.constant 0 : index
    %c0_9 = arith.constant 0 : index
    %10 = vector.load %arg5[%c0_8, %c0_9] : memref<16x128xf32, #tpu.memory_space<vmem>>, vector<16x128xf32>
    tpu.vector_store %arg5[%c0_8, %c0_9], %9 {strides = array<i32>} : memref<16x128xf32, #tpu.memory_space<vmem>>, vector<16x128xf32>,
    %c0_i32_10 = arith.constant 0 : i32
    %11 = arith.cmpi eq, %arg0, %c0_i32_10 : i32
    %12 = arith.extui %11 : i1 to i32
    %c0_i32_11 = arith.constant 0 : i32
    %13 = arith.cmpi ne, %12, %c0_i32_11 : i32
    scf.if %13 {
      %c0_12 = arith.constant 0 : index
      %c0_13 = arith.constant 0 : index
      %14 = vector.load %arg4[%c0_12, %c0_13] : memref<16x128xf32, #tpu.memory_space<vmem>>, vector<16x128xf32>
      %15 = vector.shape_cast %14 : vector<16x128xf32> to vector<1x16x128xf32>
      %cst = arith.constant dense<0.000000e+00> : vector<1xf32>
      %16 = vector.multi_reduction <add>, %15, %cst [1, 2] : vector<1x16x128xf32> to vector<1xf32>
      %17 = vector.shape_cast %16 : vector<1xf32> to vector<1x1x1xf32>
      %18 = vector.extract %17[0, 0, 0] : f32 from vector<1x1x1xf32>
      %19 = vector.broadcast %18 : f32 to vector<1x1xf32>
      %c0_14 = arith.constant 0 : index
      %c0_15 = arith.constant 0 : index
      %20 = vector.load %arg2[%c0_14, %c0_15] : memref<1x1xf32, #tpu.memory_space<vmem>>, vector<1x1xf32>
      tpu.vector_store %arg2[%c0_14, %c0_15], %19 {strides = array<i32>} : memref<1x1xf32, #tpu.memory_space<vmem>>, vector<1x1xf32>,
      %c0_16 = arith.constant 0 : index
      %c0_17 = arith.constant 0 : index
      %21 = vector.load %arg5[%c0_16, %c0_17] : memref<16x128xf32, #tpu.memory_space<vmem>>, vector<16x128xf32>
      %22 = vector.shape_cast %21 : vector<16x128xf32> to vector<1x16x128xf32>
      %cst_18 = arith.constant dense<0.000000e+00> : vector<1xf32>
      %23 = vector.multi_reduction <add>, %22, %cst_18 [1, 2] : vector<1x16x128xf32> to vector<1xf32>
      %24 = vector.shape_cast %23 : vector<1xf32> to vector<1x1x1xf32>
      %25 = vector.extract %24[0, 0, 0] : f32 from vector<1x1x1xf32>
      %26 = vector.broadcast %25 : f32 to vector<1x1xf32>
      %c0_19 = arith.constant 0 : index
      %c0_20 = arith.constant 0 : index
      %27 = vector.load %arg3[%c0_19, %c0_20] : memref<1x1xf32, #tpu.memory_space<vmem>>, vector<1x1xf32>
      tpu.vector_store %arg3[%c0_19, %c0_20], %26 {strides = array<i32>} : memref<1x1xf32, #tpu.memory_space<vmem>>, vector<1x1xf32>,
    } else {
    }
    return
  }
  func.func @transform_0(%arg0: i32) -> (i32, i32) {
    %c0_i32 = arith.constant 0 : i32
    %c0_i32_0 = arith.constant 0 : i32
    return %arg0, %c0_i32 : i32, i32
  }
  func.func @transform_1(%arg0: i32) -> (i32, i32) {
    %c0_i32 = arith.constant 0 : i32
    %c0_i32_0 = arith.constant 0 : i32
    %c0_i32_1 = arith.constant 0 : i32
    return %c0_i32, %c0_i32_0 : i32, i32
  }
  func.func @transform_2(%arg0: i32) -> (i32, i32) {
    %c0_i32 = arith.constant 0 : i32
    %c0_i32_0 = arith.constant 0 : i32
    %c0_i32_1 = arith.constant 0 : i32
    return %c0_i32, %c0_i32_0 : i32, i32
  }
}

</mosaic_0001>

<bundles_post_ra>
// kernel: tpu_custom_call.1
= control target key start
LH: loop header
LB: loop body
LE: loop exit
PB: predicated region body
PF: predicated region fallthrough
CT: control target
= control target key end

     0   :  { %8 = vsyncpa [#allocation5], 0  ;;  %s217_s0 = inlined_call_operand.hbm [shape: f32[16,128], index: 0, kind: input, shape index: {}]   ;;  %s218_s1 = inlined_call_operand.hbm [shape: f32[1,1], index: 1, kind: output, shape index: {0}]   ;;  %s219_s2 = inlined_call_operand.hbm [shape: f32[1,1], index: 2, kind: output, shape index: {1}]  }
   0x1   :  { %9 = vsyncpa [#allocation6], 0 }
   0x2   :  { %10 = vsyncpa [#allocation9], 0  ;;  %s186_s9 = smov [#allocation4]  }
   0x3   :  { %s16_s10 = sshll.u32 %s186_s9, 4  ;;  %s17_s10 = int_to_ptr.vmem [resolvable:$true] %s16_s10 }
   0x4   :  { %s128_s11 = scalar_lea.vmem %s17_s10, 256  ;;  %p133_p1 = scmp.lt.s32.totalorder %s17_s10, %s17_s10 }
   0x5   :  { %p129_p0 = scmp.ne.s32.totalorder %s17_s10, %s128_s11  ;;  %p134_p2 = scmp.lt.s32.totalorder %s128_s11, %s128_s11 }
   0x7   :  { %p135_p3 = por %p134_p2, %p133_p1 }
   0x9   :  { %p136_p4 = pnand %p135_p3, %p129_p0 }
   0xb   :  { %139 = shalt.err (!%p136_p4)
}
   0xc   :  { %s187_s12 = smov 128   ;;  %s188_s13 = smov 8  }
   0xd   :  { %22 = dma.hbm_to_vmem [thread:$0]  %s217_s0, 256, %s17_s10, [#allocation5], %s187_s12, %s187_s12, %s188_s13  }
   0xe   :  { %180 = dma.done.wait [#allocation5], 256  }
   0xf   :  { %181 = vsyncadd [#allocation5], 4294967040  ;;  %v34_v0 = vld [vmem:[#allocation4] sm:$0xff]  ;;  %v35_v1 = vld [vmem:[#allocation4 + $0x8] sm:$0xff]  ;;  %s189_s0 = smov [#allocation7]   ;;  %vm66_vm0 = vcmask 0  }
  0x10   :  { %v45_v2 = vmul.f32 %v35_v1, %v35_v1  ;;  %v55_v3 = vadd.f32 %v35_v1, %v34_v0  ;;  %v44_v4 = vmul.f32 %v34_v0, %v34_v0  ;;  %s88_s16 = sshll.u32 %s189_s0, 4  ;;  %s190_s18 = smov [#allocation8]   ;;  %s89_s16 = int_to_ptr.vmem [resolvable:$true] %s88_s16 }
  0x11   :  { %s98_s19 = sshll.u32 %s190_s18, 4  ;;  %s140_s20 = scalar_lea.vmem %s89_s16, 16  ;;  %s99_s19 = int_to_ptr.vmem [resolvable:$true] %s98_s19 }
  0x12   :  { %56 = vadd.xlane.f32.xlu0 %v55_v3  ;;  %v70_v5 = vadd.f32 %v45_v2, %v44_v4  ;;  %p141_p5 = scmp.ne.s32.totalorder %s89_s16, %s140_s20  ;;  %s144_s21 = scalar_lea.vmem %s89_s16, 32 }
  0x13   :  { %p145_p6 = scmp.lt.s32.totalorder %s89_s16, %s89_s16  ;;  %p146_p7 = scmp.lt.s32.totalorder %s144_s21, %s140_s20 }
  0x15   :  { %p147_p8 = por %p146_p7, %p145_p6 }
  0x16   :  { %71 = vadd.xlane.f32.xlu0 %v70_v5 }
  0x17   :  { %p148_p9 = pnand %p147_p8, %p141_p5 }
  0x9b   :  { %v57_v6 = vpop.xlane.xlu0 %56 }
  0x9c   :  { %v58_v7 = vrot.slane %v57_v6, 4 }
  0x9e   :  { %v59_v8 = vadd.f32 %v58_v7, %v57_v6 }
  0x9f   :  { %v72_v9 = vpop.xlane.xlu0 %71 }
  0xa0   :  { %v60_v10 = vrot.slane %v59_v8, 2  ;;  %v73_v11 = vrot.slane %v72_v9, 4 }
  0xa2   :  { %v74_v12 = vadd.f32 %v73_v11, %v72_v9  ;;  %v61_v13 = vadd.f32 %v60_v10, %v59_v8 }
  0xa4   :  { %v75_v14 = vrot.slane %v74_v12, 2  ;;  %v62_v15 = vrot.slane %v61_v13, 1 }
  0xa6   :  { %v76_v16 = vadd.f32 %v75_v14, %v74_v12  ;;  %v63_v17 = vadd.f32 %v62_v15, %v61_v13 }
  0xa8   :  { %111 = vpush %v63_v17  ;;  %v77_v18 = vrot.slane %v76_v16, 1 }
  0xaa   :  { %v78_v19 = vadd.f32 %v77_v18, %v76_v16 }
  0xac   :  { %113 = vpush %v78_v19 }
  0xd9   :  { %s112_s17 = spop %111 }
  0xda   :  { %v65_v20 = vstv %s112_s17 }
  0xdb   :  { %67 = vst.msk [vmem:[#allocation7] sm:$0x1] %vm66_vm0, %v65_v20 }
  0xdc   :  { %151 = shalt.err (!%p148_p9)
}
  0xdd   :  { %91 = dma.vmem_to_hbm [thread:$0]  %s89_s16, 16, %s218_s1, [#allocation6]  }
  0xde   :  { %s114_s24 = spop %113  ;;  %s160_s25 = scalar_lea.vmem %s99_s19, 16 }
  0xdf   :  { %v80_v21 = vstv %s114_s24  ;;  %p161_p10 = scmp.ne.s32.totalorder %s99_s19, %s160_s25  ;;  %s164_s26 = scalar_lea.vmem %s99_s19, 32 }
  0xe0   :  { %81 = vst.msk [vmem:[#allocation8] sm:$0x1] %vm66_vm0, %v80_v21  ;;  %p165_p11 = scmp.lt.s32.totalorder %s99_s19, %s99_s19  ;;  %p166_p12 = scmp.lt.s32.totalorder %s164_s26, %s160_s25 }
  0xe2   :  { %p167_p13 = por %p166_p12, %p165_p11 }
  0xe4   :  { %p168_p0 = pnand %p167_p13, %p161_p10 }
  0xe6   :  { %171 = shalt.err (!%p168_p0)
}
  0xe7   :  { %101 = dma.vmem_to_hbm [thread:$0]  %s99_s19, 16, %s219_s2, [#allocation9]  }
  0xe8   :  { %182 = dma.done.wait [#allocation6], 16  }
  0xe9   :  { %183 = vsyncadd [#allocation6], 4294967280 }
  0xea   :  { %184 = dma.done.wait [#allocation9], 16  }
  0xeb   :  { %185 = vsyncadd [#allocation9], 4294967280 }
  0xec   :  { %108 = vsyncpa [#allocation5], 1 }
  0xed   :  { %109 = vsyncpa [#allocation6], 1 }
  0xee   :  { %110 = vsyncpa [#allocation9], 1 }

</bundles_post_ra>
